<compile_context>
chip_gen: v5e
topology: v5e:2x2
jax: 0.10.0
libtpu: 0.0.40
codegen_flags: <defaults>
</compile_context>

<pallas_src>
import math
import functools

import jax
import jax.numpy as jnp
from jax.experimental import pallas as pl
from jax.experimental.pallas import tpu as pltpu


_VMEM_LIMIT_BYTES = 32 * 1024 * 1024   # explicit scoped-VMEM limit (safe on v5e/v6e/v7x)


# ---------------------------------------------------------------------------
# Kernel A: fused QKV projection  (x @ [Wq|Wk|Wv] + b, Q pre-scaled).
# ---------------------------------------------------------------------------
def _qkv_proj_kernel(x_ref, w_ref, b_ref, q_ref, k_ref, v_ref, *, n_head, scale):
    x = x_ref[0]                                              # (tm, C) compute dtype
    # Single MXU pass with N = 3C; f32 accumulation, f32 bias.
    y = jnp.dot(x, w_ref[...], preferred_element_type=jnp.float32) + b_ref[0]
    C = w_ref.shape[0]
    hd = C // n_head
    # Scale the whole Q slab once (one VPU mul per tile, free under the MXU pass).
    q_all = y[:, :C] * scale                                  # (tm, C) f32
    # Split heads once per row tile (projection epilogue) into the (head, rows, hd)
    # layout the attention kernel consumes head-batched — not in its inner loop.
    for h in range(n_head):
        q_ref[0, h] = q_all[:, h * hd:(h + 1) * hd].astype(q_ref.dtype)
        k_ref[0, h] = y[:, C + h * hd:C + (h + 1) * hd].astype(k_ref.dtype)
        v_ref[0, h] = y[:, 2 * C + h * hd:2 * C + (h + 1) * hd].astype(v_ref.dtype)


# ---------------------------------------------------------------------------
# Kernel B: flash-style causal attention with fused output projection.
# ---------------------------------------------------------------------------
def _flash_attn_proj_kernel(q_ref, k_ref, v_ref, wp_ref, bp_ref, o_ref,
                            m_ref, l_ref, acc_ref, *, tq, tk, n_head):
    qi = pl.program_id(1)
    ki = pl.program_id(2)
    q_start = qi * tq
    k_start = ki * tk

    @pl.when(ki == 0)
    def _init():
        m_ref[...] = jnp.full(m_ref.shape, -jnp.inf, jnp.float32)
        l_ref[...] = jnp.zeros(l_ref.shape, jnp.float32)
        acc_ref[...] = jnp.zeros(acc_ref.shape, jnp.float32)

    # Causal tile skip: kv tiles entirely above the diagonal contribute nothing.
    @pl.when(k_start <= q_start + (tq - 1))
    def _attend():
        q = q_ref[0]                                          # (nh, tq, hd)
        k = k_ref[0]                                          # (nh, tk, hd)
        # Head-batched QK^T: contract hd (last dim of both), no explicit transpose.
        s = jnp.einsum("hqd,hkd->hqk", q, k,
                       preferred_element_type=jnp.float32)    # (nh, tq, tk) f32

        # Per-tile causal mask from program_id offsets (no full (T, T) iota).
        # VPU/iota work is filler under the MXU-bound inner loop.
        rows = q_start + jax.lax.broadcasted_iota(jnp.int32, (tq, tk), 0)
        cols = k_start + jax.lax.broadcasted_iota(jnp.int32, (tq, tk), 1)
        s = jnp.where((rows >= cols)[None, :, :], s, -jnp.inf)

        # Online softmax update (all statistics in f32).  exp() runs on the EUP
        # (separate VLIW slot), so it overlaps the MXU work.
        m_prev = m_ref[...]
        m_new = jnp.maximum(m_prev, jnp.max(s, axis=-1, keepdims=True))
        alpha = jnp.exp(m_prev - m_new)
        p = jnp.exp(s - m_new)
        l_ref[...] = alpha * l_ref[...] + jnp.sum(p, axis=-1, keepdims=True)
        # TODO(synk): attn_drop omitted (eval-mode identity).
        acc_ref[...] = alpha * acc_ref[...] + jnp.einsum(
            "hqk,hkd->hqd", p.astype(v_ref.dtype), v_ref[0],
            preferred_element_type=jnp.float32)
        m_ref[...] = m_new

    # Epilogue at the final kv step: normalize once per query row and fuse the
    # output projection (+ bias), writing a lane-dense (tq, C) block.
    @pl.when(ki == pl.num_programs(2) - 1)
    def _finalize():
        inv_l = pl.reciprocal(l_ref[...], approx=True)        # (nh, tq, 1) on EUP
        y = acc_ref[...] * inv_l                              # (nh, tq, hd) f32
        out = jnp.dot(y[0].astype(wp_ref.dtype), wp_ref[0],
                      preferred_element_type=jnp.float32)
        for h in range(1, n_head):
            out = out + jnp.dot(y[h].astype(wp_ref.dtype), wp_ref[h],
                                preferred_element_type=jnp.float32)
        # TODO(synk): resid_drop omitted (eval-mode identity).
        o_ref[0] = (out + bp_ref[0]).astype(o_ref.dtype)


# ---------------------------------------------------------------------------
# Wrapper
# ---------------------------------------------------------------------------
def causal_self_attention(x, params, n_head, *, q_block=None, kv_block=None,
                          row_block=None, compute_dtype=jnp.bfloat16):
    """x: (B, T, C).  params: (C, C) weights (pre-transposed) and (C,) biases."""
    B, T, C = x.shape
    assert C % n_head == 0
    hd = C // n_head
    scale = 1.0 / math.sqrt(hd)

    tm = row_block or min(T, 128)
    tq = q_block or min(T, 128)
    tk = kv_block or min(T, 128)
    assert T % tm == 0 and T % tq == 0 and T % tk == 0
    # TODO(synk): production configs should use C % 128 == 0 and hd >= 128 for
    # lane-dense layouts; the toy config below is lane-sparse but correct.

    # Fuse QKV weights/biases; cast MXU operands to compute_dtype (bf16) once,
    # keep biases in f32.  Wp is pre-split per head -> (n_head, hd, C).
    wqkv = jnp.concatenate([params["wq"], params["wk"], params["wv"]], axis=1)
    wqkv = wqkv.astype(compute_dtype)                                   # (C, 3C)
    bqkv = jnp.concatenate([params["bq"], params["bk"], params["bv"]])
    bqkv = bqkv.reshape(1, 3 * C).astype(jnp.float32)                   # (1, 3C)
    wp3 = params["wp"].reshape(n_head, hd, C).astype(compute_dtype)     # (nh, hd, C)
    bp = params["bp"].reshape(1, C).astype(jnp.float32)                 # (1, C)

    # ---- Kernel A: fused QKV projection -> q, k, v in (B, n_head, T, hd) ----
    qkv_kernel = functools.partial(_qkv_proj_kernel, n_head=n_head, scale=scale)
    q, k, v = pl.pallas_call(
        qkv_kernel,
        out_shape=(
            jax.ShapeDtypeStruct((B, n_head, T, hd), compute_dtype),
            jax.ShapeDtypeStruct((B, n_head, T, hd), compute_dtype),
            jax.ShapeDtypeStruct((B, n_head, T, hd), compute_dtype),
        ),
        grid_spec=pltpu.PrefetchScalarGridSpec(
            num_scalar_prefetch=0,
            grid=(B, T // tm),
            in_specs=[
                pl.BlockSpec((1, tm, C), lambda b, i: (b, i, 0)),       # x rows
                pl.BlockSpec((C, 3 * C), lambda b, i: (0, 0)),          # Wqkv (resident)
                pl.BlockSpec((1, 3 * C), lambda b, i: (0, 0)),          # bqkv (resident)
            ],
            out_specs=(
                pl.BlockSpec((1, n_head, tm, hd), lambda b, i: (b, 0, i, 0)),
                pl.BlockSpec((1, n_head, tm, hd), lambda b, i: (b, 0, i, 0)),
                pl.BlockSpec((1, n_head, tm, hd), lambda b, i: (b, 0, i, 0)),
            ),
        ),
        compiler_params=pltpu.CompilerParams(
            dimension_semantics=("parallel", "parallel"),
            vmem_limit_bytes=_VMEM_LIMIT_BYTES,
        ),
    )(x.astype(compute_dtype), wqkv, bqkv)

    # ---- Kernel B: flash attention + fused output projection ----
    num_q = T // tq
    num_kv = T // tk

    def q_index_map(b, qi, ki):
        return (b, 0, qi, 0)

    def kv_index_map(b, qi, ki):
        # Clamp to the last causally-needed kv tile so skipped (fully masked)
        # iterations re-use the resident block instead of issuing new DMAs.
        last_needed = (qi * tq + (tq - 1)) // tk
        return (b, 0, jnp.minimum(ki, last_needed), 0)

    attn_kernel = functools.partial(_flash_attn_proj_kernel,
                                    tq=tq, tk=tk, n_head=n_head)
    out = pl.pallas_call(
        attn_kernel,
        out_shape=jax.ShapeDtypeStruct((B, T, C), x.dtype),
        grid_spec=pltpu.PrefetchScalarGridSpec(
            num_scalar_prefetch=0,
            grid=(B, num_q, num_kv),
            in_specs=[
                pl.BlockSpec((1, n_head, tq, hd), q_index_map),         # Q
                pl.BlockSpec((1, n_head, tk, hd), kv_index_map),        # K
                pl.BlockSpec((1, n_head, tk, hd), kv_index_map),        # V
                pl.BlockSpec((n_head, hd, C), lambda b, qi, ki: (0, 0, 0)),  # Wp
                pl.BlockSpec((1, C), lambda b, qi, ki: (0, 0)),              # bp
            ],
            out_specs=pl.BlockSpec((1, tq, C), lambda b, qi, ki: (b, qi, 0)),
            scratch_shapes=[
                pltpu.VMEM((n_head, tq, 1), jnp.float32),   # m (running max)
                pltpu.VMEM((n_head, tq, 1), jnp.float32),   # l (running denom)
                pltpu.VMEM((n_head, tq, hd), jnp.float32),  # acc
            ],
        ),
        compiler_params=pltpu.CompilerParams(
            dimension_semantics=("parallel", "parallel", "arbitrary"),
            vmem_limit_bytes=_VMEM_LIMIT_BYTES,
        ),
    )(q, k, v, wp3, bp)
    return out


# ---------------------------------------------------------------------------
# Plain-JAX reference matching the PyTorch forward (dropout = identity).
# ---------------------------------------------------------------------------
def _reference(x, params, n_head):
    B, T, C = x.shape
    hd = C // n_head

    def lin(x, w, b):
        return jnp.einsum("btc,cd->btd", x, w) + b

    q = lin(x, params["wq"], params["bq"]).reshape(B, T, n_head, hd).transpose(0, 2, 1, 3)
    k = lin(x, params["wk"], params["bk"]).reshape(B, T, n_head, hd).transpose(0, 2, 1, 3)
    v = lin(x, params["wv"], params["bv"]).reshape(B, T, n_head, hd).transpose(0, 2, 1, 3)

    att = jnp.einsum("bhtd,bhsd->bhts", q, k) * (1.0 / math.sqrt(hd))
    mask = jnp.tril(jnp.ones((T, T), dtype=bool))
    att = jnp.where(mask[None, None], att, -jnp.inf)
    att = jax.nn.softmax(att, axis=-1)
    y = jnp.einsum("bhts,bhsd->bhtd", att, v)
    y = y.transpose(0, 2, 1, 3).reshape(B, T, C)
    return lin(y, params["wp"], params["bp"])


if __name__ == "__main__":
    # Small config: batch=2, seq=8, n_embd=32, n_head=4 (head_dim=8).
    B, T, C, n_head = 2, 8, 32, 4

    key = jax.random.PRNGKey(0)
    keys = jax.random.split(key, 9)
    wscale = 0.02
    params = {
        "wq": wscale * jax.random.normal(keys[0], (C, C), jnp.float32),
        "bq": wscale * jax.random.normal(keys[1], (C,), jnp.float32),
        "wk": wscale * jax.random.normal(keys[2], (C, C), jnp.float32),
        "bk": wscale * jax.random.normal(keys[3], (C,), jnp.float32),
        "wv": wscale * jax.random.normal(keys[4], (C, C), jnp.float32),
        "bv": wscale * jax.random.normal(keys[5], (C,), jnp.float32),
        "wp": wscale * jax.random.normal(keys[6], (C, C), jnp.float32),
        "bp": wscale * jax.random.normal(keys[7], (C,), jnp.float32),
    }
    x = jax.random.normal(keys[8], (B, T, C), jnp.float32)

    ref = _reference(x, params, n_head)

    # bf16 MXU operands / f32 accumulation (production path on v6e/v7x).
    out = causal_self_attention(x, params, n_head)
    out = jax.block_until_ready(out)
    assert out.shape == (B, T, C)
    assert jnp.allclose(out, ref, atol=3e-2, rtol=3e-2), "bf16 path mismatch vs reference"

    # f32 path (tighter numerical check of the kernel structure itself).
    out_f32 = causal_self_attention(x, params, n_head, compute_dtype=jnp.float32)
    out_f32 = jax.block_until_ready(out_f32)
    assert jnp.allclose(out_f32, ref, atol=5e-3, rtol=5e-3), "f32 path mismatch vs reference"

    print("KERNEL_OK")
</pallas_src>

<mosaic_0001>
module attributes {stable_mosaic.version = 11 : i64} {
  func.func @_qkv_proj_kernel(%arg0: i32, %arg1: i32, %arg2: memref<1x8x32xbf16, #tpu.memory_space<vmem>>, %arg3: memref<32x96xbf16, #tpu.memory_space<vmem>>, %arg4: memref<1x96xf32, #tpu.memory_space<vmem>>, %arg5: memref<1x4x8x8xbf16, #tpu.memory_space<vmem>>, %arg6: memref<1x4x8x8xbf16, #tpu.memory_space<vmem>>, %arg7: memref<1x4x8x8xbf16, #tpu.memory_space<vmem>>) attributes {dimension_semantics = [#tpu.dimension_semantics<parallel>, #tpu.dimension_semantics<parallel>], iteration_bounds = array<i64: 2, 1>, scalar_prefetch = 0 : i64, scratch_operands = 0 : i64, tpu.core_type = #tpu.core_type<tc>, window_params = [{transform_indices = @transform_0, window_bounds = array<i64: 1, 8, 32>}, {pipeline_mode = #tpu.pipeline_mode<synchronous>, transform_indices = @transform_1, window_bounds = array<i64: 32, 96>}, {pipeline_mode = #tpu.pipeline_mode<synchronous>, transform_indices = @transform_2, window_bounds = array<i64: 1, 96>}, {transform_indices = @transform_3, window_bounds = array<i64: 1, 4, 8, 8>}, {transform_indices = @transform_4, window_bounds = array<i64: 1, 4, 8, 8>}, {transform_indices = @transform_5, window_bounds = array<i64: 1, 4, 8, 8>}]} {
    %c0 = arith.constant 0 : index
    %c0_0 = arith.constant 0 : index
    %c0_1 = arith.constant 0 : index
    %0 = vector.load %arg2[%c0, %c0_0, %c0_1] : memref<1x8x32xbf16, #tpu.memory_space<vmem>>, vector<1x8x32xbf16>
    %1 = vector.shape_cast %0 : vector<1x8x32xbf16> to vector<8x32xbf16>
    %c0_2 = arith.constant 0 : index
    %c0_3 = arith.constant 0 : index
    %2 = vector.load %arg3[%c0_2, %c0_3] : memref<32x96xbf16, #tpu.memory_space<vmem>>, vector<32x96xbf16>
    %cst = arith.constant dense<0.000000e+00> : vector<8x96xf32>
    %3 = tpu.matmul %1, %2, %cst {dimension_numbers = #tpu.dot_dimension_numbers<[1], [0], [0], [1], [0, 0, 1, 1], [], []>} : vector<8x32xbf16>, vector<32x96xbf16>, vector<8x96xf32> -> vector<8x96xf32>
    %c0_4 = arith.constant 0 : index
    %c0_5 = arith.constant 0 : index
    %4 = vector.load %arg4[%c0_4, %c0_5] : memref<1x96xf32, #tpu.memory_space<vmem>>, vector<1x96xf32>
    %5 = vector.shape_cast %4 : vector<1x96xf32> to vector<96xf32>
    %6 = vector.shape_cast %5 : vector<96xf32> to vector<1x96xf32>
    %7 = vector.broadcast %6 : vector<1x96xf32> to vector<8x96xf32>
    %8 = arith.addf %3, %7 : vector<8x96xf32>
    %9 = vector.extract_strided_slice %8 {offsets = [0, 0], sizes = [8, 32], strides = [1, 1]} : vector<8x96xf32> to vector<8x32xf32>
    %cst_6 = arith.constant 0.353553385 : f32
    %10 = vector.broadcast %cst_6 : f32 to vector<8x32xf32>
    %11 = arith.mulf %9, %10 : vector<8x32xf32>
    %12 = vector.extract_strided_slice %11 {offsets = [0, 0], sizes = [8, 8], strides = [1, 1]} : vector<8x32xf32> to vector<8x8xf32>
    %13 = arith.truncf %12 : vector<8x8xf32> to vector<8x8xbf16>
    %c0_7 = arith.constant 0 : index
    %c0_8 = arith.constant 0 : index
    %c0_9 = arith.constant 0 : index
    %c0_10 = arith.constant 0 : index
    %14 = vector.load %arg5[%c0_7, %c0_8, %c0_9, %c0_10] : memref<1x4x8x8xbf16, #tpu.memory_space<vmem>>, vector<1x1x8x8xbf16>
    %15 = vector.shape_cast %14 : vector<1x1x8x8xbf16> to vector<8x8xbf16>
    %16 = vector.shape_cast %13 : vector<8x8xbf16> to vector<1x1x8x8xbf16>
    tpu.vector_store %arg5[%c0_7, %c0_8, %c0_9, %c0_10], %16 {strides = array<i32>} : memref<1x4x8x8xbf16, #tpu.memory_space<vmem>>, vector<1x1x8x8xbf16>,
    %17 = vector.extract_strided_slice %8 {offsets = [0, 32], sizes = [8, 8], strides = [1, 1]} : vector<8x96xf32> to vector<8x8xf32>
    %18 = arith.truncf %17 : vector<8x8xf32> to vector<8x8xbf16>
    %c0_11 = arith.constant 0 : index
    %c0_12 = arith.constant 0 : index
    %c0_13 = arith.constant 0 : index
    %c0_14 = arith.constant 0 : index
    %19 = vector.load %arg6[%c0_11, %c0_12, %c0_13, %c0_14] : memref<1x4x8x8xbf16, #tpu.memory_space<vmem>>, vector<1x1x8x8xbf16>
    %20 = vector.shape_cast %19 : vector<1x1x8x8xbf16> to vector<8x8xbf16>
    %21 = vector.shape_cast %18 : vector<8x8xbf16> to vector<1x1x8x8xbf16>
    tpu.vector_store %arg6[%c0_11, %c0_12, %c0_13, %c0_14], %21 {strides = array<i32>} : memref<1x4x8x8xbf16, #tpu.memory_space<vmem>>, vector<1x1x8x8xbf16>,
    %22 = vector.extract_strided_slice %8 {offsets = [0, 64], sizes = [8, 8], strides = [1, 1]} : vector<8x96xf32> to vector<8x8xf32>
    %23 = arith.truncf %22 : vector<8x8xf32> to vector<8x8xbf16>
    %c0_15 = arith.constant 0 : index
    %c0_16 = arith.constant 0 : index
    %c0_17 = arith.constant 0 : index
    %c0_18 = arith.constant 0 : index
    %24 = vector.load %arg7[%c0_15, %c0_16, %c0_17, %c0_18] : memref<1x4x8x8xbf16, #tpu.memory_space<vmem>>, vector<1x1x8x8xbf16>
    %25 = vector.shape_cast %24 : vector<1x1x8x8xbf16> to vector<8x8xbf16>
    %26 = vector.shape_cast %23 : vector<8x8xbf16> to vector<1x1x8x8xbf16>
    tpu.vector_store %arg7[%c0_15, %c0_16, %c0_17, %c0_18], %26 {strides = array<i32>} : memref<1x4x8x8xbf16, #tpu.memory_space<vmem>>, vector<1x1x8x8xbf16>,
    %27 = vector.extract_strided_slice %11 {offsets = [0, 8], sizes = [8, 8], strides = [1, 1]} : vector<8x32xf32> to vector<8x8xf32>
    %28 = arith.truncf %27 : vector<8x8xf32> to vector<8x8xbf16>
    %c0_19 = arith.constant 0 : index
    %c1 = arith.constant 1 : index
    %c0_20 = arith.constant 0 : index
    %c0_21 = arith.constant 0 : index
    %29 = vector.load %arg5[%c0_19, %c1, %c0_20, %c0_21] : memref<1x4x8x8xbf16, #tpu.memory_space<vmem>>, vector<1x1x8x8xbf16>
    %30 = vector.shape_cast %29 : vector<1x1x8x8xbf16> to vector<8x8xbf16>
    %31 = vector.shape_cast %28 : vector<8x8xbf16> to vector<1x1x8x8xbf16>
    tpu.vector_store %arg5[%c0_19, %c1, %c0_20, %c0_21], %31 {strides = array<i32>} : memref<1x4x8x8xbf16, #tpu.memory_space<vmem>>, vector<1x1x8x8xbf16>,
    %32 = vector.extract_strided_slice %8 {offsets = [0, 40], sizes = [8, 8], strides = [1, 1]} : vector<8x96xf32> to vector<8x8xf32>
    %33 = arith.truncf %32 : vector<8x8xf32> to vector<8x8xbf16>
    %c0_22 = arith.constant 0 : index
    %c1_23 = arith.constant 1 : index
    %c0_24 = arith.constant 0 : index
    %c0_25 = arith.constant 0 : index
    %34 = vector.load %arg6[%c0_22, %c1_23, %c0_24, %c0_25] : memref<1x4x8x8xbf16, #tpu.memory_space<vmem>>, vector<1x1x8x8xbf16>
    %35 = vector.shape_cast %34 : vector<1x1x8x8xbf16> to vector<8x8xbf16>
    %36 = vector.shape_cast %33 : vector<8x8xbf16> to vector<1x1x8x8xbf16>
    tpu.vector_store %arg6[%c0_22, %c1_23, %c0_24, %c0_25], %36 {strides = array<i32>} : memref<1x4x8x8xbf16, #tpu.memory_space<vmem>>, vector<1x1x8x8xbf16>,
    %37 = vector.extract_strided_slice %8 {offsets = [0, 72], sizes = [8, 8], strides = [1, 1]} : vector<8x96xf32> to vector<8x8xf32>
    %38 = arith.truncf %37 : vector<8x8xf32> to vector<8x8xbf16>
    %c0_26 = arith.constant 0 : index
    %c1_27 = arith.constant 1 : index
    %c0_28 = arith.constant 0 : index
    %c0_29 = arith.constant 0 : index
    %39 = vector.load %arg7[%c0_26, %c1_27, %c0_28, %c0_29] : memref<1x4x8x8xbf16, #tpu.memory_space<vmem>>, vector<1x1x8x8xbf16>
    %40 = vector.shape_cast %39 : vector<1x1x8x8xbf16> to vector<8x8xbf16>
    %41 = vector.shape_cast %38 : vector<8x8xbf16> to vector<1x1x8x8xbf16>
    tpu.vector_store %arg7[%c0_26, %c1_27, %c0_28, %c0_29], %41 {strides = array<i32>} : memref<1x4x8x8xbf16, #tpu.memory_space<vmem>>, vector<1x1x8x8xbf16>,
    %42 = vector.extract_strided_slice %11 {offsets = [0, 16], sizes = [8, 8], strides = [1, 1]} : vector<8x32xf32> to vector<8x8xf32>
    %43 = arith.truncf %42 : vector<8x8xf32> to vector<8x8xbf16>
    %c0_30 = arith.constant 0 : index
    %c2 = arith.constant 2 : index
    %c0_31 = arith.constant 0 : index
    %c0_32 = arith.constant 0 : index
    %44 = vector.load %arg5[%c0_30, %c2, %c0_31, %c0_32] : memref<1x4x8x8xbf16, #tpu.memory_space<vmem>>, vector<1x1x8x8xbf16>
    %45 = vector.shape_cast %44 : vector<1x1x8x8xbf16> to vector<8x8xbf16>
    %46 = vector.shape_cast %43 : vector<8x8xbf16> to vector<1x1x8x8xbf16>
    tpu.vector_store %arg5[%c0_30, %c2, %c0_31, %c0_32], %46 {strides = array<i32>} : memref<1x4x8x8xbf16, #tpu.memory_space<vmem>>, vector<1x1x8x8xbf16>,
    %47 = vector.extract_strided_slice %8 {offsets = [0, 48], sizes = [8, 8], strides = [1, 1]} : vector<8x96xf32> to vector<8x8xf32>
    %48 = arith.truncf %47 : vector<8x8xf32> to vector<8x8xbf16>
    %c0_33 = arith.constant 0 : index
    %c2_34 = arith.constant 2 : index
    %c0_35 = arith.constant 0 : index
    %c0_36 = arith.constant 0 : index
    %49 = vector.load %arg6[%c0_33, %c2_34, %c0_35, %c0_36] : memref<1x4x8x8xbf16, #tpu.memory_space<vmem>>, vector<1x1x8x8xbf16>
    %50 = vector.shape_cast %49 : vector<1x1x8x8xbf16> to vector<8x8xbf16>
    %51 = vector.shape_cast %48 : vector<8x8xbf16> to vector<1x1x8x8xbf16>
    tpu.vector_store %arg6[%c0_33, %c2_34, %c0_35, %c0_36], %51 {strides = array<i32>} : memref<1x4x8x8xbf16, #tpu.memory_space<vmem>>, vector<1x1x8x8xbf16>,
    %52 = vector.extract_strided_slice %8 {offsets = [0, 80], sizes = [8, 8], strides = [1, 1]} : vector<8x96xf32> to vector<8x8xf32>
    %53 = arith.truncf %52 : vector<8x8xf32> to vector<8x8xbf16>
    %c0_37 = arith.constant 0 : index
    %c2_38 = arith.constant 2 : index
    %c0_39 = arith.constant 0 : index
    %c0_40 = arith.constant 0 : index
    %54 = vector.load %arg7[%c0_37, %c2_38, %c0_39, %c0_40] : memref<1x4x8x8xbf16, #tpu.memory_space<vmem>>, vector<1x1x8x8xbf16>
    %55 = vector.shape_cast %54 : vector<1x1x8x8xbf16> to vector<8x8xbf16>
    %56 = vector.shape_cast %53 : vector<8x8xbf16> to vector<1x1x8x8xbf16>
    tpu.vector_store %arg7[%c0_37, %c2_38, %c0_39, %c0_40], %56 {strides = array<i32>} : memref<1x4x8x8xbf16, #tpu.memory_space<vmem>>, vector<1x1x8x8xbf16>,
    %57 = vector.extract_strided_slice %11 {offsets = [0, 24], sizes = [8, 8], strides = [1, 1]} : vector<8x32xf32> to vector<8x8xf32>
    %58 = arith.truncf %57 : vector<8x8xf32> to vector<8x8xbf16>
    %c0_41 = arith.constant 0 : index
    %c3 = arith.constant 3 : index
    %c0_42 = arith.constant 0 : index
    %c0_43 = arith.constant 0 : index
    %59 = vector.load %arg5[%c0_41, %c3, %c0_42, %c0_43] : memref<1x4x8x8xbf16, #tpu.memory_space<vmem>>, vector<1x1x8x8xbf16>
    %60 = vector.shape_cast %59 : vector<1x1x8x8xbf16> to vector<8x8xbf16>
    %61 = vector.shape_cast %58 : vector<8x8xbf16> to vector<1x1x8x8xbf16>
    tpu.vector_store %arg5[%c0_41, %c3, %c0_42, %c0_43], %61 {strides = array<i32>} : memref<1x4x8x8xbf16, #tpu.memory_space<vmem>>, vector<1x1x8x8xbf16>,
    %62 = vector.extract_strided_slice %8 {offsets = [0, 56], sizes = [8, 8], strides = [1, 1]} : vector<8x96xf32> to vector<8x8xf32>
    %63 = arith.truncf %62 : vector<8x8xf32> to vector<8x8xbf16>
    %c0_44 = arith.constant 0 : index
    %c3_45 = arith.constant 3 : index
    %c0_46 = arith.constant 0 : index
    %c0_47 = arith.constant 0 : index
    %64 = vector.load %arg6[%c0_44, %c3_45, %c0_46, %c0_47] : memref<1x4x8x8xbf16, #tpu.memory_space<vmem>>, vector<1x1x8x8xbf16>
    %65 = vector.shape_cast %64 : vector<1x1x8x8xbf16> to vector<8x8xbf16>
    %66 = vector.shape_cast %63 : vector<8x8xbf16> to vector<1x1x8x8xbf16>
    tpu.vector_store %arg6[%c0_44, %c3_45, %c0_46, %c0_47], %66 {strides = array<i32>} : memref<1x4x8x8xbf16, #tpu.memory_space<vmem>>, vector<1x1x8x8xbf16>,
    %67 = vector.extract_strided_slice %8 {offsets = [0, 88], sizes = [8, 8], strides = [1, 1]} : vector<8x96xf32> to vector<8x8xf32>
    %68 = arith.truncf %67 : vector<8x8xf32> to vector<8x8xbf16>
    %c0_48 = arith.constant 0 : index
    %c3_49 = arith.constant 3 : index
    %c0_50 = arith.constant 0 : index
    %c0_51 = arith.constant 0 : index
    %69 = vector.load %arg7[%c0_48, %c3_49, %c0_50, %c0_51] : memref<1x4x8x8xbf16, #tpu.memory_space<vmem>>, vector<1x1x8x8xbf16>
    %70 = vector.shape_cast %69 : vector<1x1x8x8xbf16> to vector<8x8xbf16>
    %71 = vector.shape_cast %68 : vector<8x8xbf16> to vector<1x1x8x8xbf16>
    tpu.vector_store %arg7[%c0_48, %c3_49, %c0_50, %c0_51], %71 {strides = array<i32>} : memref<1x4x8x8xbf16, #tpu.memory_space<vmem>>, vector<1x1x8x8xbf16>,
    return
  }
  func.func @transform_0(%arg0: i32, %arg1: i32) -> (i32, i32, i32) {
    %c0_i32 = arith.constant 0 : i32
    %c0_i32_0 = arith.constant 0 : i32
    return %arg0, %arg1, %c0_i32 : i32, i32, i32
  }
  func.func @transform_1(%arg0: i32, %arg1: i32) -> (i32, i32) {
    %c0_i32 = arith.constant 0 : i32
    %c0_i32_0 = arith.constant 0 : i32
    %c0_i32_1 = arith.constant 0 : i32
    return %c0_i32, %c0_i32_0 : i32, i32
  }
  func.func @transform_2(%arg0: i32, %arg1: i32) -> (i32, i32) {
    %c0_i32 = arith.constant 0 : i32
    %c0_i32_0 = arith.constant 0 : i32
    %c0_i32_1 = arith.constant 0 : i32
    return %c0_i32, %c0_i32_0 : i32, i32
  }
  func.func @transform_3(%arg0: i32, %arg1: i32) -> (i32, i32, i32, i32) {
    %c0_i32 = arith.constant 0 : i32
    %c0_i32_0 = arith.constant 0 : i32
    %c0_i32_1 = arith.constant 0 : i32
    return %arg0, %c0_i32, %arg1, %c0_i32_0 : i32, i32, i32, i32
  }
  func.func @transform_4(%arg0: i32, %arg1: i32) -> (i32, i32, i32, i32) {
    %c0_i32 = arith.constant 0 : i32
    %c0_i32_0 = arith.constant 0 : i32
    %c0_i32_1 = arith.constant 0 : i32
    return %arg0, %c0_i32, %arg1, %c0_i32_0 : i32, i32, i32, i32
  }
  func.func @transform_5(%arg0: i32, %arg1: i32) -> (i32, i32, i32, i32) {
    %c0_i32 = arith.constant 0 : i32
    %c0_i32_0 = arith.constant 0 : i32
    %c0_i32_1 = arith.constant 0 : i32
    return %arg0, %c0_i32, %arg1, %c0_i32_0 : i32, i32, i32, i32
  }
}

</mosaic_0001>

<bundles_post_ra>
// kernel: tpu_custom_call.1
= control target key start
LH: loop header
LB: loop body
LE: loop exit
PB: predicated region body
PF: predicated region fallthrough
CT: control target
= control target key end

     0   :  { %s1260_s0 = inlined_call_operand.hbm [shape: bf16[2,8,32], index: 0, kind: input, shape index: {}]   ;;  %s1261_s1 = inlined_call_operand.hbm [shape: bf16[32,96], index: 1, kind: input, shape index: {}]   ;;  %s1262_s2 = inlined_call_operand.vmem [shape: f32[1,96], index: 2, kind: input, shape index: {}]   ;;  %s1263_s3 = inlined_call_operand.hbm [shape: bf16[2,4,8,8], index: 3, kind: output, shape index: {0}]   ;;  %s1264_s4 = inlined_call_operand.hbm [shape: bf16[2,4,8,8], index: 4, kind: output, shape index: {1}]   ;;  %s1265_s5 = inlined_call_operand.hbm [shape: bf16[2,4,8,8], index: 5, kind: output, shape index: {2}]  }
   0x1   :  { %1271 = sst [smem:[#allocation15_spill]] %s1260_s0 }
   0x2   :  { %11 = vsyncpa [#allocation3], 0 }
   0x3   :  { %13 = vsyncpa [#allocation3 + $0x1], 0 }
   0x4   :  { %14 = vsyncpa [#allocation6], 0 }
   0x5   :  { %15 = vsyncpa [#allocation4], 0 }
   0x6   :  { %17 = vsyncpa [#allocation4 + $0x1], 0 }
   0x7   :  { %18 = vsyncpa [#allocation9], 0 }
   0x8   :  { %20 = vsyncpa [#allocation9 + $0x1], 0  ;;  %s1019_s18 = smov 0   ;;  %s1021_s19 = smov 0  }
   0x9   :  { %s1023_s20 = smov 0   ;;  %s1025_s21 = smov 0  }
   0xa   :  { %s1027_s22 = smov 0   ;;  %s1029_s23 = smov 0  }
   0xb LB: > { %s1050_s24 = sadd.s32 4294967295, %s972_s23   ;;  %p623_p0 = scmp.ge.s32.totalorder %s972_s23, 1  ;;  %s972_s23 = sphi %s1029_s23, %s26_s23   ;;  %s968_s22 = sphi %s1027_s22, %s1285_s22   ;;  %s964_s21 = sphi %s1025_s21, %s1284_s21   ;;  %s960_s20 = sphi %s1023_s20, %s1283_s20   ;;  %s956_s19 = sphi %s1021_s19, %s1282_s19   ;;  %s952_s18 = sphi %s1019_s18, %s1281_s18  }
   0xc   : > { %p61_p1 = scmp.eq.s32.totalorder %s1050_s24, 0  ;;  %p197_p2 = scmp.lt.s32.totalorder %s972_s23, 3 }
   0xd   : > { %s208_s27 = sshll.u32 %s1261_s1, 4  ;;  %s974_s29 = smov [#allocation5]   ;;  %s209_s27 = int_to_ptr.hbm [resolvable:$true] %s208_s27 }
   0xe   : > { %p1058_p3 = pnand %p623_p0, %p197_p2  ;;  %s210_s30 = sshll.u32 %s974_s29, 4  ;;  %s211_s30 = int_to_ptr.vmem [resolvable:$true] %s210_s30 }
   0xf   : > { %p625_p6 = scmp.ge.s32.totalorder %s972_s23, 2  ;;  %s975_s6 = smov 64  }
  0x10   : > { %p680_p4 = pneg %p1058_p3  ;;  %s976_s7 = smov 4  }
  0x11   : > { %s1266_s8 = sadd.s32 4294967294, %s972_s23   ;;  %s38_s9 = sadd.s32 1, %s968_s22 }
  0x12   : > { %p681_p5 = pnand %p680_p4, %p61_p1  ;;  %s47_s10 = sadd.s32 1, %s960_s20 }
  0x13   : > { %p40_p7 = scmp.ge.s32.totalorder %s38_s9, 2  ;;  %p54_p8 = scmp.ne.s32.totalorder %s960_s20, %s956_s19 }
  0x14   : > { %683 = dma.hbm_to_vmem [thread:$0]  (!%p681_p5), %s209_s27, 256, %s211_s30, [#allocation6], %s975_s6, %s975_s6, %s976_s7  }
  0x15   : > { %p55_p9 = scmp.eq.s32.totalorder %s972_s23, 0  ;;  %p60_p10 = scmp.ne.s32.totalorder %s956_s19, %s952_s18 }
  0x16   : > { %s1287_s9 = smov (%p40_p7, %s38_s9), 0  ;;  %p128_p13 = scmp.eq.s32.totalorder %s1050_s24, 1 }
  0x17   : > { %p1077_p11 = por %p55_p9, %p54_p8  ;;  %p1083_p12 = por %p61_p1, %p60_p10 }
  0x18   : > { %s42_s13 = ssub.s32 %s968_s22, %s1287_s9  ;;  %p134_p2 = scmp.eq.s32.totalorder %s1266_s8, 1 }
  0x19   : > { %p45_p0 = scmp.eq.s32.totalorder %s42_s13, 0  ;;  %p1092_p4 = por %p128_p13, %p54_p8 }
  0x1a   : > { %p699_p5 = scmp.lt.s32.totalorder %s972_s23, 2  ;;  %p1100_p7 = por %p134_p2, %p60_p10 }
  0x1b   : > { %s1098_s15 = scalar_select %p45_p0, %s960_s20, %s47_s10  }
  0x1c   : > { %s227_s17 = sand.u32 1, %s960_s20   ;;  %s627_s26 = sshll.u32 %s968_s22, 2 }
  0x1d   : > { %s626_s25 = sshll.u32 %s227_s17, 2  ;;  %s1277_s0 = sld [smem:[#allocation15_spill]] }
  0x1e   : > { %s231_s6 = scalar_lea.vmem [#allocation2], %s626_s25  ;;  %p685_p8 = pnand %p699_p5, %p1077_p11 }
  0x1f   : > { %s240_s7 = sshll.u32 %s231_s6, 4  ;;  %s228_s10 = scalar_lea.sflag [#allocation3], %s227_s17  ;;  %s241_s7 = int_to_ptr.vmem [resolvable:$true] %s240_s7 }
  0x20   : > { %s1114_s8 = sand.u32 (!%p1058_p3), 1, %s956_s19  }
  0x21   : > { %249 = sbr.rel (%p1058_p3) target bundleno = 334 (0x14e), region = 32  ;;  %s629_s27 = sshll.u32 (!%p1058_p3), %s1114_s8, 2 }
  0x22   : > { %s255_s25 = scalar_lea.vmem (!%p1058_p3), [#allocation2], %s629_s27 }
  0x23   : > { %s236_s30 = scalar_lea.hbm %s1277_s0, %s627_s26  ;;  %s252_s26 = scalar_lea.sflag (!%p1058_p3), [#allocation3], %s1114_s8 }
  0x24   : > { %s238_s13 = sshll.u32 %s236_s30, 4  ;;  %s239_s13 = int_to_ptr.hbm [resolvable:$true] %s238_s13 }
  0x25   : > { %687 = dma.hbm_to_vmem [thread:$0]  (!%p685_p8), %s239_s13, 64, %s241_s7, %s228_s10  }
  0x26   : > { %935 = dma.done.wait (%p1083_p12), %s252_s26, 64  }
  0x27   : > { %937 = vsyncadd (%p1083_p12), %s252_s26, 4294967232 }
  0x28   : > { %939 = dma.done.wait (%p61_p1), [#allocation6], 256  }
  0x29   : > { %941 = vsyncadd (%p61_p1), [#allocation6], 4294967040  ;;  %v664_v0 = vld [vmem:[#allocation5 + $0x8] sm:$0xff]  ;;  %v663_v1 = vld [vmem:[#allocation5] sm:$0xff]  ;;  %vm320_vm0 = vcmask 261120   ;;  %s1130_s12 = sshll.u32 %s1114_s8, 4 }
  0x2a   : > { %330 = vmatpush.bf16.msra.mxu0 %v664_v0  ;;  %v299_v2 = vld [vmem:[%s255_s25] sm:$0xf]  ;;  %vm339_vm1 = vcmask 60416   ;;  %s1267_s17 = smov 64   ;;  %s978_s29 = smov 80  }
  0x2b   : > { %v765_v3 = vld [vmem:[%s1262_s2] ss:$0 sm:$0xff]  ;;  %s979_s30 = smov 96   ;;  %s1134_s6 = scalar_lea.vmem [#allocation7], %s1130_s12 }
  0x2c   : > { %s980_s7 = smov 72   ;;  %s981_s13 = smov 120  }
  0x2d   : > { %s982_s10 = smov 88   ;;  %s983_s27 = smov 112  }
  0x2e   : > { %331 = vmatpush.bf16.msra.mxu0 %v663_v1  ;;  %s984_s26 = smov 48   ;;  %s985_s25 = smov 56  }
  0x2f   : > { %s986_s28 = smov 40   ;;  %s987_s11 = smov 104  }
  0x31   : > { %642 = vmatmul.msk.bf16.vlgmr.msra.gmra.mxu0 %vm320_vm0, %v299_v2 }
  0xae   : > { %v333_v4 = vpop.f32.mrf.mxu0 }
  0xaf   : > { %v334_v5 = vadd.f32 %v765_v3, %v333_v4 }
  0xb1   : > { %v337_v6 = vmul.f32 0.35355338, %v334_v5  ;;  %v341_v7 = vpack.c.bf16 %v334_v5, %v334_v5 }
  0xb3   : > { %v338_v8 = vpack.c.bf16 %v337_v6, %v337_v6  ;;  %347 = vrot.lane.b32.xlu2 %v341_v7, %s1267_s17  ;;  %372 = vrot.lane.b32.xlu1 %v341_v7, %s978_s29  ;;  %s1139_s29 = scalar_lea.vmem [#allocation10], %s1130_s12 }
  0xb4   : > { %343 = vrot.lane.b32.xlu0 %v341_v7, %s979_s30  ;;  %s1148_s30 = sshll.u32 %s964_s21, 4 }
  0xb5   : > { %340 = vst.msk [vmem:[%s1134_s6] sm:$0xf] %vm339_vm1, %v338_v8 }
  0xb6   : > { %v335_v9 = vpop.f32.mrf.mxu0 }
  0xbb   : > { %387 = vrot.lane.b32.xlu1 %v341_v7, %s980_s7  ;;  %352 = vrot.lane.b32.xlu2 %v338_v8, %s981_s13  ;;  %s290_s7 = scalar_lea.vmem [#allocation8], %s1130_s12 }
  0xbc   : > { %357 = vrot.lane.b32.xlu0 %v341_v7, %s982_s10  ;;  %s846_s10 = scalar_lea.hbm %s1264_s4, 32 }
  0xc3   : > { %367 = vrot.lane.b32.xlu1 %v338_v8, %s983_s27  ;;  %377 = vrot.lane.b32.xlu2 %v341_v7, %s984_s26  ;;  %s438_s27 = scalar_lea.hbm %s1264_s4, %s1148_s30  ;;  %s439_s26 = sshll.u32 %s290_s7, 4  ;;  %s440_s26 = int_to_ptr.vmem [resolvable:$true] %s439_s26 }
  0xc4   : > { %362 = vrot.lane.b32.xlu0 %v341_v7, %s985_s25  ;;  %s402_s25 = sand.u32 1, %s1050_s24  }
  0xc5   : > { %s1160_s21 = scalar_lea.sflag [#allocation9], %s402_s25 }
  0xcb   : > { %392 = vrot.lane.b32.xlu1 %v341_v7, %s986_s28  ;;  %s441_s28 = sshll.u32 %s438_s27, 4  ;;  %s442_s28 = int_to_ptr.hbm [resolvable:$true] %s441_s28 }
  0xcc   : > { %382 = vrot.lane.b32.xlu0 %v338_v8, %s987_s11  ;;  %s840_s12 = sshra.s32 %s442_s28, 4  ;;  %s841_s12 = int_to_ptr.hbm [resolvable:$true] %s840_s12 }
  0xcd   : > { %s842_s11 = scalar_lea.hbm %s841_s12, 16  ;;  %p847_p10 = scmp.lt.s32.totalorder %s841_s12, %s1264_s4 }
  0xce   : > { %p843_p1 = scmp.ne.s32.totalorder %s841_s12, %s842_s11  ;;  %p848_p11 = scmp.lt.s32.totalorder %s846_s10, %s842_s11 }
  0xd0   : > { %p844_p3 = pnand %p843_p1, %p1092_p4  ;;  %p849_p12 = por %p848_p11, %p847_p10 }
  0xd2   : > { %p845_p9 = pneg %p844_p3 }
  0xd4   : > { %p850_p13 = pnand %p849_p12, %p845_p9 }
 0x10d   : > { %v348_v10 = vpop.permute.xlu2 %347 }
 0x10e   : > { %350 = vst.msk [vmem:[%s1139_s29] sm:$0xf] %vm339_vm1, %v348_v10 }
 0x115   : > { %v353_v11 = vpop.permute.xlu2 %352 }
 0x116   : > { %643 = vst.msk [vmem:[%s1134_s6 + $0x4] sm:$0xf] %vm339_vm1, %v353_v11 }
 0x11d   : > { %v378_v12 = vpop.permute.xlu2 %377 }
 0x11e   : > { %648 = vst.msk [vmem:[%s1139_s29 + $0x8] sm:$0xf] %vm339_vm1, %v378_v12 }
 0x125   : > { %v373_v13 = vpop.permute.xlu1 %372 }
 0x126   : > { %647 = vst.msk [vmem:[%s290_s7 + $0x8] sm:$0xf] %vm339_vm1, %v373_v13  ;;  %v344_v14 = vpop.permute.xlu0 %343 }
 0x127   : > { %346 = vst.msk [vmem:[%s290_s7] sm:$0xf] %vm339_vm1, %v344_v14 }
 0x12d   : > { %v388_v15 = vpop.permute.xlu1 %387 }
 0x12e   : > { %650 = vst.msk [vmem:[%s290_s7 + $0xc] sm:$0xf] %vm339_vm1, %v388_v15  ;;  %v358_v16 = vpop.permute.xlu0 %357 }
 0x12f   : > { %644 = vst.msk [vmem:[%s290_s7 + $0x4] sm:$0xf] %vm339_vm1, %v358_v16 }
 0x130   : > { %853 = shalt.err (!%p850_p13)
}
 0x131   : > { %s1269_s7 = smov 4   ;;  %s1278_s25 = smov 64  }
 0x132   : > { %675 = dma.vmem_to_hbm [thread:$0]  (%p1092_p4), %s440_s26, 256, %s442_s28, %s1160_s21, %s1278_s25, %s1278_s25, %s1269_s7  }
 0x133   : > { %s420_s11 = scalar_lea.hbm %s1263_s3, %s1148_s30  ;;  %s456_s10 = scalar_lea.hbm %s1265_s5, %s1148_s30 }
 0x134   : > { %s421_s27 = sshll.u32 %s1134_s6, 4  ;;  %s1189_s0 = sshll.u32 %s420_s11, 4  ;;  %s422_s27 = int_to_ptr.vmem [resolvable:$true] %s421_s27  ;;  %s424_s0 = int_to_ptr.hbm [resolvable:$true] %s1189_s0 }
 0x135   : > { %v368_v17 = vpop.permute.xlu1 %367  ;;  %s457_s26 = sshll.u32 %s1139_s29, 4  ;;  %s1192_s28 = sshll.u32 %s456_s10, 4  ;;  %s1195_s26 = int_to_ptr.vmem [resolvable:$true] %s457_s26  ;;  %s460_s28 = int_to_ptr.hbm [resolvable:$true] %s1192_s28 }
 0x136   : > { %v363_v18 = vpop.permute.xlu0 %362  ;;  %646 = vst.msk [vmem:[%s1134_s6 + $0x8] sm:$0xf] %vm339_vm1, %v368_v17  ;;  %s398_s30 = scalar_lea.sflag [#allocation4], %s1114_s8  ;;  %s868_s17 = sshra.s32 %s424_s0, 4  ;;  %s869_s17 = int_to_ptr.hbm [resolvable:$true] %s868_s17 }
 0x137   : > { %645 = vst.msk [vmem:[%s1139_s29 + $0x4] sm:$0xf] %vm339_vm1, %v363_v18  ;;  %s870_s12 = scalar_lea.hbm %s869_s17, 16  ;;  %s874_s24 = scalar_lea.hbm %s1263_s3, 32 }
 0x138   : > { %p871_p0 = scmp.ne.s32.totalorder %s869_s17, %s870_s12  ;;  %p875_p8 = scmp.lt.s32.totalorder %s869_s17, %s1263_s3 }
 0x139   : > { %p876_p1 = scmp.lt.s32.totalorder %s874_s24, %s870_s12 }
 0x13a   : > { %p872_p2 = pnand %p871_p0, %p1092_p4 }
 0x13b   : > { %p877_p3 = por %p876_p1, %p875_p8 }
 0x13c   : > { %p873_p5 = pneg %p872_p2 }
 0x13d   : > { %v393_v19 = vpop.permute.xlu1 %392 }
 0x13e   : > { %v383_v20 = vpop.permute.xlu0 %382  ;;  %651 = vst.msk [vmem:[%s1139_s29 + $0xc] sm:$0xf] %vm339_vm1, %v393_v19  ;;  %p878_p9 = pnand %p877_p3, %p873_p5 }
 0x13f   : > { %649 = vst.msk [vmem:[%s1134_s6 + $0xc] sm:$0xf] %vm339_vm1, %v383_v20 }
 0x140   : > { %881 = shalt.err (!%p878_p9)
}
 0x141   : > { %s1279_s8 = smov 4   ;;  %s896_s6 = sshra.s32 %s460_s28, 4  ;;  %s897_s6 = int_to_ptr.hbm [resolvable:$true] %s896_s6 }
 0x142   : > { %674 = dma.vmem_to_hbm [thread:$0]  (%p1092_p4), %s422_s27, 256, %s424_s0, %s398_s30, %s1278_s25, %s1278_s25, %s1279_s8  }
 0x143   : > { %s898_s29 = scalar_lea.hbm %s897_s6, 16  ;;  %s902_s12 = scalar_lea.hbm %s1265_s5, 32 }
 0x144   : > { %p899_p10 = scmp.ne.s32.totalorder %s897_s6, %s898_s29  ;;  %p903_p13 = scmp.lt.s32.totalorder %s897_s6, %s1265_s5 }
 0x145   : > { %p904_p0 = scmp.lt.s32.totalorder %s902_s12, %s898_s29 }
 0x146   : > { %p900_p11 = pnand %p899_p10, %p1092_p4 }
 0x147   : > { %p905_p2 = por %p904_p0, %p903_p13 }
 0x148   : > { %p901_p12 = pneg %p900_p11 }
 0x14a   : > { %p906_p5 = pnand %p905_p2, %p901_p12 }
 0x14c   : > { %909 = shalt.err (!%p906_p5)
}
 0x14d   : > { %676 = dma.vmem_to_hbm [thread:$0]  (%p1092_p4), %s1195_s26, 256, %s460_s28, %s1160_s21, %s1278_s25, %s1278_s25, %s1279_s8  }
 0x14e PF: > { %s474_s0 = sand.u32 1, %s952_s18   ;;  %p689_p8 = pnand %p625_p6, %p1100_p7 }
 0x14f   : > { %s475_s27 = scalar_lea.sflag [#allocation4], %s474_s0 }
 0x150   : > { %p690_p1 = pneg %p689_p8 }
 0x152   : > { %943 = dma.done.wait (%p690_p1), %s475_s27, 256  }
 0x153   : > { %945 = vsyncadd (%p690_p1), %s475_s27, 4294967040  ;;  %s1280_s14 = sadd.s32 4294967294, %s972_s23  }
 0x154   : > { %s484_s30 = sand.u32 1, %s1280_s14  }
 0x155   : > { %s485_s24 = scalar_lea.sflag [#allocation9], %s484_s30 }
 0x156   : > { %947 = dma.done.wait (%p690_p1), %s485_s24, 512  }
 0x157   : > { %949 = vsyncadd (%p690_p1), %s485_s24, 4294966784  ;;  %s26_s23 = sadd.s32 1, %s972_s23   ;;  %s1281_s18 = smov %s956_s19 }
 0x158   : > { %p23_p4 = scmp.ge.s32.totalorder %s26_s23, 4   ;;  %s1282_s19 = smov %s960_s20 }
 0x159   : > { %s1283_s20 = smov %s1098_s15  ;;  %s1284_s21 = smov %s968_s22 }
 0x15a   : > { %s1285_s22 = smov %s1287_s9  ;;  %25 = sbr.rel (!%p23_p4) target bundleno = 11 (0xb), region = 122 }
 0x15f   :  { %501 = vsyncpa [#allocation3], 1 }
 0x160   :  { %503 = vsyncpa [#allocation3 + $0x1], 1 }
 0x161   :  { %504 = vsyncpa [#allocation6], 1 }
 0x162   :  { %505 = vsyncpa [#allocation4], 1 }
 0x163   :  { %507 = vsyncpa [#allocation4 + $0x1], 1 }
 0x164   :  { %508 = vsyncpa [#allocation9], 1 }
 0x165   :  { %510 = vsyncpa [#allocation9 + $0x1], 1 }

</bundles_post_ra>
